<compile_context>
chip_gen: v6e
topology: v6e:2x2x1
jax: 0.10.0
libtpu: 0.0.40
codegen_flags: <defaults>
</compile_context>

<pallas_src>
import functools

import jax
import jax.numpy as jnp
import numpy as np
from jax import lax
from jax.experimental import pallas as pl
from jax.experimental.pallas import tpu as pltpu

_NEG_FILL = -1.0e30   # class-axis pad value: never wins a max, never the target
_LANE = 128


# -----------------------------------------------------------------------------
# Fused kernel.  grid = (H, C_blocks), C innermost ("arbitrary" reduction axis).
#   refs: tcol (N,1) i32, trow (1,N) i32, sm tile (1,N,TC),
#         [trip (T,N,D)], [side (3,N,Ds)], out (1,8),
#         scratch: m_run,l_run,tgt_run (N,1) f32, best_f (N,1) f32, xent_acc (1,1) f32
#   out row: [loss, prec_batch, trip_prec, softmax_prec, trip1, xent, sac, 0]
# -----------------------------------------------------------------------------
def _loss_multi_kernel(num_heads, num_trip, use_sac, margin1,
                       alpha, gamma, theta, *refs):
    idx = 0
    tcol_ref = refs[idx]; idx += 1
    trow_ref = refs[idx]; idx += 1
    sm_ref = refs[idx]; idx += 1
    trip_ref = None
    if num_trip > 0:
        trip_ref = refs[idx]; idx += 1
    side_ref = None
    if use_sac:
        side_ref = refs[idx]; idx += 1
    out_ref = refs[idx]; idx += 1
    m_run, l_run, tgt_run, best_f, xent_acc = refs[idx:idx + 5]

    h = pl.program_id(0)
    cb = pl.program_id(1)
    last_cb = pl.num_programs(1) - 1

    tcol = tcol_ref[...]                               # (N, 1) int32
    n = tcol.shape[0]
    inv_n = 1.0 / float(n)                             # Python float -> literal

    # ---- per-head accumulator init (start of each head's C sweep) -----------
    @pl.when(cb == 0)
    def _():
        m_run[...] = jnp.full(m_run.shape, -jnp.inf, m_run.dtype)
        l_run[...] = jnp.zeros(l_run.shape, l_run.dtype)
        tgt_run[...] = jnp.zeros(tgt_run.shape, tgt_run.dtype)

    @pl.when((cb == 0) & (h == 0))
    def _():
        xent_acc[...] = jnp.zeros(xent_acc.shape, xent_acc.dtype)
        best_f[...] = jnp.zeros(best_f.shape, best_f.dtype)

    # ---- streaming (flash) cross-entropy tile update -------------------------
    logits = sm_ref[0].astype(jnp.float32)             # (N, TC), per-tile upcast
    tc = logits.shape[1]
    col = lax.broadcasted_iota(jnp.int32, logits.shape, 1) + cb * tc
    tile_max = jnp.max(logits, axis=1, keepdims=True)  # (N, 1)
    m_old = m_run[...]
    m_new = jnp.maximum(m_old, tile_max)
    tile_sum = jnp.sum(jnp.exp(logits - m_new), axis=1, keepdims=True)
    l_run[...] = l_run[...] * jnp.exp(m_old - m_new) + tile_sum
    m_run[...] = m_new
    # target-logit gather folded into the sweep (target lands in exactly one tile)
    tgt_run[...] = tgt_run[...] + jnp.sum(
        jnp.where(col == tcol, logits, 0.0), axis=1, keepdims=True)

    # ---- head-0 running argmax (first-index tie-break) ----------------------
    @pl.when(h == 0)
    def _():
        colf = col.astype(jnp.float32)
        tile_arg = jnp.min(jnp.where(logits >= tile_max, colf, 3.0e38),
                           axis=1, keepdims=True)
        best_f[...] = jnp.where(tile_max > m_old, tile_arg, best_f[...])

    # ---- per-head CE finalize -------------------------------------------------
    @pl.when(cb == last_cb)
    def _():
        nll = m_run[...] + jnp.log(l_run[...]) - tgt_run[...]          # (N, 1)
        xent_acc[...] = (xent_acc[...]
                         + jnp.sum(nll, axis=0, keepdims=True) * inv_n)

    # ---- last grid step: triplet heads, SAC, weighted sum, packed output ----
    @pl.when((h == num_heads - 1) & (cb == last_cb))
    def _():
        xent = xent_acc[...]                                           # (1, 1)
        prec_sf = jnp.sum(
            (best_f[...] == tcol.astype(jnp.float32)).astype(jnp.float32),
            axis=0, keepdims=True) * inv_n

        trip1 = jnp.zeros((1, 1), jnp.float32)
        prec = jnp.zeros((1, 1), jnp.float32)
        if num_trip > 0:
            same = tcol == trow_ref[...]                               # (N, N)
            for t in range(num_trip):
                f = trip_ref[t].astype(jnp.float32)                    # (N, D)
                d = f.shape[1]
                # Gram in f32 on the MXU -> self-distance stays ~0 (numerics fix)
                g = lax.dot_general(f, f, (((1,), (1,)), ((), ())),
                                    preferred_element_type=jnp.float32)
                f2 = f * f
                sq_col = jnp.sum(f2, axis=1, keepdims=True)            # (N, 1)
                # (1, N) squared-norm row via ones-vector matmul (no (N,N) diag mask)
                sq_row = lax.dot_general(jnp.ones((1, d), jnp.float32), f2,
                                         (((1,), (1,)), ((), ())),
                                         preferred_element_type=jnp.float32)
                dist = jnp.sqrt(jnp.maximum(sq_col + sq_row - 2.0 * g, 1e-12))
                # hard positive includes the (~0) self-distance like the reference
                # mask; fine for num_instances >= 2.
                dist_ap = jnp.max(jnp.where(same, dist, -1e30),
                                  axis=1, keepdims=True)
                dist_an = jnp.min(jnp.where(same, 1e30, dist),
                                  axis=1, keepdims=True)
                # F.margin_ranking_loss(dist_an, dist_ap, y=1, margin1), mean
                hinge = jnp.maximum(dist_ap - dist_an + margin1, 0.0)
                trip1 = trip1 + jnp.sum(hinge, axis=0, keepdims=True) * inv_n
                # prec of the LAST triplet head survives (matches reference loop)
                prec = jnp.sum((dist_an > dist_ap).astype(jnp.float32),
                               axis=0, keepdims=True) * inv_n

        sac = jnp.zeros((1, 1), jnp.float32)
        if use_sac:
            l2 = side_ref[0].astype(jnp.float32)
            l3 = side_ref[1].astype(jnp.float32)
            l4 = side_ref[2].astype(jnp.float32)
            d42 = l4 - l2
            d43 = l4 - l3
            s42 = jnp.sum(jnp.sum(d42 * d42, axis=1, keepdims=True),
                          axis=0, keepdims=True)
            s43 = jnp.sum(jnp.sum(d43 * d43, axis=1, keepdims=True),
                          axis=0, keepdims=True)
            sac = jnp.sqrt(s42) + jnp.sqrt(s43)

        # beta * TripletLoss2 is identically 0 on the config.trip path.
        loss = alpha * trip1 + gamma * xent
        if use_sac:
            loss = loss + theta * sac
        prec_batch = jnp.maximum(prec, prec_sf)

        ocol = lax.broadcasted_iota(jnp.int32, (1, out_ref.shape[1]), 1)
        packed = jnp.where(ocol == 0, loss, 0.0)
        packed = packed + jnp.where(ocol == 1, prec_batch, 0.0)
        packed = packed + jnp.where(ocol == 2, prec, 0.0)
        packed = packed + jnp.where(ocol == 3, prec_sf, 0.0)
        packed = packed + jnp.where(ocol == 4, trip1, 0.0)
        packed = packed + jnp.where(ocol == 5, xent, 0.0)
        packed = packed + jnp.where(ocol == 6, sac, 0.0)
        out_ref[...] = packed.astype(jnp.float32)


def _round_up(x, m):
    return ((x + m - 1) // m) * m


def loss_multi_forward(softmax_out, trip_heads, side_feats, targets, *,
                       use_sac, margin1, alpha, beta, gamma, theta,
                       class_tile=2048):
    """Single fused pallas_call (grid over heads x class-blocks)."""
    del beta  # TripletLoss2 is identically 0 on the config.trip path
    n = int(targets.shape[0])
    tcol = jnp.asarray(targets, jnp.int32).reshape(n, 1)
    trow = jnp.asarray(targets, jnp.int32).reshape(1, n)

    # ---- stack softmax heads into one (H, N, Cpad) operand -------------------
    num_heads = len(softmax_out)
    sm_dtype = jnp.result_type(*softmax_out)           # bf16 accepted (HBM BW)
    c_max = max(int(s.shape[1]) for s in softmax_out)
    c_pad = _round_up(c_max, _LANE)
    tile_c = _round_up(min(int(class_tile), c_pad), _LANE)
    c_pad = _round_up(c_pad, tile_c)
    n_cb = c_pad // tile_c

    heads = []
    for s in softmax_out:
        s = jnp.asarray(s, sm_dtype)
        pad = c_pad - int(s.shape[1])
        if pad:
            s = jnp.pad(s, ((0, 0), (0, pad)), constant_values=_NEG_FILL)
        heads.append(s)
    sm_stack = jnp.stack(heads, axis=0)                # (H, N, Cpad)

    operands = [tcol, trow, sm_stack]
    in_specs = [
        pl.BlockSpec((n, 1), lambda h, cb: (0, 0)),
        pl.BlockSpec((1, n), lambda h, cb: (0, 0)),
        pl.BlockSpec((1, n, tile_c), lambda h, cb: (h, 0, cb)),
    ]

    num_trip = len(trip_heads)
    if num_trip > 0:
        tr_dtype = jnp.result_type(*trip_heads)
        d_max = max(int(t.shape[1]) for t in trip_heads)
        tr = []
        for t in trip_heads:
            t = jnp.asarray(t, tr_dtype)
            pad = d_max - int(t.shape[1])
            if pad:
                t = jnp.pad(t, ((0, 0), (0, pad)))     # zero pad: norms/Gram unchanged
            tr.append(t)
        trip_stack = jnp.stack(tr, axis=0)             # (T, N, D)
        operands.append(trip_stack)
        in_specs.append(pl.BlockSpec(trip_stack.shape, lambda h, cb: (0, 0, 0)))

    if use_sac:
        side_stack = jnp.stack([jnp.asarray(s) for s in side_feats], axis=0)
        operands.append(side_stack)
        in_specs.append(pl.BlockSpec(side_stack.shape, lambda h, cb: (0, 0, 0)))

    kernel = functools.partial(
        _loss_multi_kernel, num_heads, num_trip, bool(use_sac),
        float(margin1), float(alpha), float(gamma), float(theta))

    out = pl.pallas_call(
        kernel,
        out_shape=jax.ShapeDtypeStruct((1, 8), jnp.float32),
        grid=(num_heads, n_cb),
        in_specs=in_specs,
        out_specs=pl.BlockSpec((1, 8), lambda h, cb: (0, 0)),
        scratch_shapes=[
            pltpu.VMEM((n, 1), jnp.float32),   # m_run   (online LSE max)
            pltpu.VMEM((n, 1), jnp.float32),   # l_run   (online LSE sum)
            pltpu.VMEM((n, 1), jnp.float32),   # tgt_run (target logit)
            pltpu.VMEM((n, 1), jnp.float32),   # best_f  (head-0 argmax index)
            pltpu.VMEM((1, 1), jnp.float32),   # xent_acc
        ],
        compiler_params=pltpu.CompilerParams(
            # both axes carry accumulator state in scratch -> reduction axes
            dimension_semantics=("arbitrary", "arbitrary"),
            vmem_limit_bytes=32 * 1024 * 1024,
        ),
    )(*operands)
    return out[0, 0], out[0, 1]


# -----------------------------------------------------------------------------
# Loss_Multi wrapper (config.trip + config.sac path)
# -----------------------------------------------------------------------------
class Config:
    num_instances = 2
    alpha = 1.0
    beta = 1.0
    gamma = 1.0
    theta = 0.1
    margin1 = 0.5
    margin2 = 0.5
    trip = True
    trip_weight = False
    quad = False
    rank_loss = False
    sac = True
    trip_weight_pos_radius_divide = 1.0
    trip_weight_neg_radius_divide = 1.0
    weight_margin = 0.5
    trip_com = False


class LossMulti:
    def __init__(self, config):
        self.config = config
        self.num_instances = config.num_instances
        self.alpha = config.alpha
        self.beta = config.beta
        self.gamma = config.gamma
        self.theta = config.theta
        self.margin1 = config.margin1
        self.margin2 = config.margin2
        if config.trip_weight and (not config.trip) and (not config.quad):
            self.margin2 = config.weight_margin

    def __call__(self, inputs, targets):
        num_input = len(inputs)
        if num_input == 3:
            softmax_out, trip_out, features = inputs
            l2_side = l3_side = l4_side = None
        elif num_input == 6:
            softmax_out, trip_out, l2_side, l3_side, l4_side, features = inputs
        else:
            raise ValueError("inputs must have 3 or 6 entries")

        trip_path = (self.config.trip and not self.config.trip_weight
                     and not self.config.quad and not self.config.rank_loss)
        # TODO(synk): trip_weight / quad / rank_loss branches rely on
        # data-dependent sorting + Python-side dynamic loops (and pdb); only
        # the config.trip hard-triplet path is implemented.
        trip_heads = list(trip_out) if trip_path else []
        use_sac = bool(self.config.sac) and (l2_side is not None)
        sides = (l2_side, l3_side, l4_side) if use_sac else ()

        return loss_multi_forward(
            list(softmax_out), trip_heads, sides, targets,
            use_sac=use_sac, margin1=self.margin1,
            alpha=self.alpha, beta=self.beta, gamma=self.gamma,
            theta=self.theta)


# -----------------------------------------------------------------------------
# Plain-JAX reference (self-test only)
# -----------------------------------------------------------------------------
def _reference_forward(softmax_out, trip_out, sides, targets, cfg):
    xent = 0.0
    for s in softmax_out:
        s = jnp.asarray(s, jnp.float32)
        lse = jax.nn.logsumexp(s, axis=1)
        tgt = jnp.take_along_axis(s, targets[:, None], axis=1)[:, 0]
        xent = xent + jnp.mean(lse - tgt)
    pred = jnp.argmax(jnp.asarray(softmax_out[0], jnp.float32), axis=1)
    prec_sf = jnp.mean((pred == targets).astype(jnp.float32))
    trip1, prec = 0.0, 0.0
    for f in trip_out:
        f = jnp.asarray(f, jnp.float32)
        sq = jnp.sum(f * f, axis=1, keepdims=True)
        g = jnp.dot(f, f.T, precision=lax.Precision.HIGHEST)
        d = jnp.sqrt(jnp.maximum(sq + sq.T - 2.0 * g, 1e-12))
        same = targets[:, None] == targets[None, :]
        ap = jnp.max(jnp.where(same, d, -1e30), axis=1)
        an = jnp.min(jnp.where(same, 1e30, d), axis=1)
        trip1 = trip1 + jnp.mean(jnp.maximum(ap - an + cfg.margin1, 0.0))
        prec = jnp.mean((an > ap).astype(jnp.float32))
    sac = 0.0
    if cfg.sac:
        l2, l3, l4 = [jnp.asarray(x, jnp.float32) for x in sides]
        sac = jnp.sqrt(jnp.sum((l4 - l2) ** 2)) + jnp.sqrt(jnp.sum((l4 - l3) ** 2))
    loss = cfg.alpha * trip1 + cfg.gamma * xent
    if cfg.sac:
        loss = loss + cfg.theta * sac
    return loss, jnp.maximum(prec, prec_sf)


# -----------------------------------------------------------------------------
if __name__ == "__main__":
    key = jax.random.PRNGKey(0)
    N = 8            # batch
    NUM_INST = 2     # instances per identity -> 4 identities
    C = 16           # softmax classes
    D = 32           # embedding dim (trip + side features)

    keys = jax.random.split(key, 8)
    softmax_out = [jax.random.normal(keys[0], (N, C), dtype=jnp.float32),
                   jax.random.normal(keys[1], (N, C), dtype=jnp.float32)]
    trip_out = [jax.random.normal(keys[2], (N, D), dtype=jnp.float32)]
    l2_side = jax.random.normal(keys[3], (N, D), dtype=jnp.float32)
    l3_side = jax.random.normal(keys[4], (N, D), dtype=jnp.float32)
    l4_side = jax.random.normal(keys[5], (N, D), dtype=jnp.float32)
    features = jax.random.normal(keys[6], (N, D), dtype=jnp.float32)
    targets = jnp.repeat(jnp.arange(N // NUM_INST, dtype=jnp.int32), NUM_INST)

    cfg = Config()
    loss_fn = LossMulti(cfg)
    inputs = (softmax_out, trip_out, l2_side, l3_side, l4_side, features)

    loss, prec_batch = loss_fn(inputs, targets)
    jax.block_until_ready((loss, prec_batch))

    # correctness sanity check vs. a plain-JAX reference (loose tolerance on the
    # loss absorbs MXU-precision deltas; precision values are exact fractions).
    ref_loss, ref_prec = _reference_forward(
        softmax_out, trip_out, (l2_side, l3_side, l4_side), targets, cfg)
    np.testing.assert_allclose(np.asarray(loss), np.asarray(ref_loss),
                               rtol=5e-2, atol=5e-2)
    np.testing.assert_allclose(np.asarray(prec_batch), np.asarray(ref_prec),
                               rtol=1e-6, atol=1e-6)

    print("KERNEL_OK")
</pallas_src>

<mosaic_0001>
module attributes {stable_mosaic.version = 11 : i64} {
  func.func @_loss_multi_kernel(%arg0: i32, %arg1: i32, %arg2: memref<8x1xi32, #tpu.memory_space<vmem>>, %arg3: memref<1x8xi32, #tpu.memory_space<vmem>>, %arg4: memref<1x8x128xf32, #tpu.memory_space<vmem>>, %arg5: memref<1x8x32xf32, #tpu.memory_space<vmem>>, %arg6: memref<3x8x32xf32, #tpu.memory_space<vmem>>, %arg7: memref<1x8xf32, #tpu.memory_space<vmem>>, %arg8: memref<8x1xf32, #tpu.memory_space<vmem>>, %arg9: memref<8x1xf32, #tpu.memory_space<vmem>>, %arg10: memref<8x1xf32, #tpu.memory_space<vmem>>, %arg11: memref<8x1xf32, #tpu.memory_space<vmem>>, %arg12: memref<1x1xf32, #tpu.memory_space<vmem>>) attributes {dimension_semantics = [#tpu.dimension_semantics<arbitrary>, #tpu.dimension_semantics<arbitrary>], iteration_bounds = array<i64: 2, 1>, scalar_prefetch = 0 : i64, scratch_operands = 5 : i64, tpu.core_type = #tpu.core_type<tc>, window_params = [{pipeline_mode = #tpu.pipeline_mode<synchronous>, transform_indices = @transform_0, window_bounds = array<i64: 8, 1>}, {pipeline_mode = #tpu.pipeline_mode<synchronous>, transform_indices = @transform_1, window_bounds = array<i64: 1, 8>}, {transform_indices = @transform_2, window_bounds = array<i64: 1, 8, 128>}, {pipeline_mode = #tpu.pipeline_mode<synchronous>, transform_indices = @transform_3, window_bounds = array<i64: 1, 8, 32>}, {pipeline_mode = #tpu.pipeline_mode<synchronous>, transform_indices = @transform_4, window_bounds = array<i64: 3, 8, 32>}, {pipeline_mode = #tpu.pipeline_mode<synchronous>, transform_indices = @transform_5, window_bounds = array<i64: 1, 8>}]} {
    %c0 = arith.constant 0 : index
    %c0_0 = arith.constant 0 : index
    %0 = vector.load %arg2[%c0, %c0_0] : memref<8x1xi32, #tpu.memory_space<vmem>>, vector<8x1xi32>
    %c0_i32 = arith.constant 0 : i32
    %1 = arith.cmpi eq, %arg1, %c0_i32 : i32
    %2 = arith.extui %1 : i1 to i32
    %c0_i32_1 = arith.constant 0 : i32
    %3 = arith.cmpi ne, %2, %c0_i32_1 : i32
    scf.if %3 {
      %cst_29 = arith.constant 0xFF800000 : f32
      %51 = vector.broadcast %cst_29 : f32 to vector<8x1xf32>
      %c0_30 = arith.constant 0 : index
      %c0_31 = arith.constant 0 : index
      %52 = vector.load %arg8[%c0_30, %c0_31] : memref<8x1xf32, #tpu.memory_space<vmem>>, vector<8x1xf32>
      tpu.vector_store %arg8[%c0_30, %c0_31], %51 {strides = array<i32>} : memref<8x1xf32, #tpu.memory_space<vmem>>, vector<8x1xf32>,
      %cst_32 = arith.constant 0.000000e+00 : f32
      %53 = vector.broadcast %cst_32 : f32 to vector<8x1xf32>
      %c0_33 = arith.constant 0 : index
      %c0_34 = arith.constant 0 : index
      %54 = vector.load %arg9[%c0_33, %c0_34] : memref<8x1xf32, #tpu.memory_space<vmem>>, vector<8x1xf32>
      tpu.vector_store %arg9[%c0_33, %c0_34], %53 {strides = array<i32>} : memref<8x1xf32, #tpu.memory_space<vmem>>, vector<8x1xf32>,
      %cst_35 = arith.constant 0.000000e+00 : f32
      %55 = vector.broadcast %cst_35 : f32 to vector<8x1xf32>
      %c0_36 = arith.constant 0 : index
      %c0_37 = arith.constant 0 : index
      %56 = vector.load %arg10[%c0_36, %c0_37] : memref<8x1xf32, #tpu.memory_space<vmem>>, vector<8x1xf32>
      tpu.vector_store %arg10[%c0_36, %c0_37], %55 {strides = array<i32>} : memref<8x1xf32, #tpu.memory_space<vmem>>, vector<8x1xf32>,
    } else {
    }
    %c0_i32_2 = arith.constant 0 : i32
    %4 = arith.cmpi eq, %arg1, %c0_i32_2 : i32
    %c0_i32_3 = arith.constant 0 : i32
    %5 = arith.cmpi eq, %arg0, %c0_i32_3 : i32
    %6 = arith.andi %4, %5 : i1
    %7 = arith.extui %6 : i1 to i32
    %c0_i32_4 = arith.constant 0 : i32
    %8 = arith.cmpi ne, %7, %c0_i32_4 : i32
    scf.if %8 {
      %cst_29 = arith.constant 0.000000e+00 : f32
      %51 = vector.broadcast %cst_29 : f32 to vector<1x1xf32>
      %c0_30 = arith.constant 0 : index
      %c0_31 = arith.constant 0 : index
      %52 = vector.load %arg12[%c0_30, %c0_31] : memref<1x1xf32, #tpu.memory_space<vmem>>, vector<1x1xf32>
      tpu.vector_store %arg12[%c0_30, %c0_31], %51 {strides = array<i32>} : memref<1x1xf32, #tpu.memory_space<vmem>>, vector<1x1xf32>,
      %cst_32 = arith.constant 0.000000e+00 : f32
      %53 = vector.broadcast %cst_32 : f32 to vector<8x1xf32>
      %c0_33 = arith.constant 0 : index
      %c0_34 = arith.constant 0 : index
      %54 = vector.load %arg11[%c0_33, %c0_34] : memref<8x1xf32, #tpu.memory_space<vmem>>, vector<8x1xf32>
      tpu.vector_store %arg11[%c0_33, %c0_34], %53 {strides = array<i32>} : memref<8x1xf32, #tpu.memory_space<vmem>>, vector<8x1xf32>,
    } else {
    }
    %c0_5 = arith.constant 0 : index
    %c0_6 = arith.constant 0 : index
    %c0_7 = arith.constant 0 : index
    %9 = vector.load %arg4[%c0_5, %c0_6, %c0_7] : memref<1x8x128xf32, #tpu.memory_space<vmem>>, vector<1x8x128xf32>
    %10 = vector.shape_cast %9 : vector<1x8x128xf32> to vector<8x128xf32>
    %11 = tpu.iota {dimensions = array<i32: 1>} : vector<8x128xi32>
    %c128_i32 = arith.constant 128 : i32
    %12 = arith.muli %arg1, %c128_i32 : i32
    %13 = vector.broadcast %12 : i32 to vector<8x128xi32>
    %14 = arith.addi %11, %13 : vector<8x128xi32>
    %cst = arith.constant dense<0xFF800000> : vector<8xf32>
    %15 = vector.multi_reduction <maximumf>, %10, %cst [1] : vector<8x128xf32> to vector<8xf32>
    %16 = vector.shape_cast %15 : vector<8xf32> to vector<8x1xf32>
    %c0_8 = arith.constant 0 : index
    %c0_9 = arith.constant 0 : index
    %17 = vector.load %arg8[%c0_8, %c0_9] : memref<8x1xf32, #tpu.memory_space<vmem>>, vector<8x1xf32>
    %18 = arith.maximumf %17, %16 : vector<8x1xf32>
    %19 = vector.broadcast %18 : vector<8x1xf32> to vector<8x128xf32>
    %20 = arith.subf %10, %19 : vector<8x128xf32>
    %21 = math.exp %20 : vector<8x128xf32>
    %cst_10 = arith.constant dense<0.000000e+00> : vector<8xf32>
    %22 = vector.multi_reduction <add>, %21, %cst_10 [1] : vector<8x128xf32> to vector<8xf32>
    %23 = vector.shape_cast %22 : vector<8xf32> to vector<8x1xf32>
    %c0_11 = arith.constant 0 : index
    %c0_12 = arith.constant 0 : index
    %24 = vector.load %arg9[%c0_11, %c0_12] : memref<8x1xf32, #tpu.memory_space<vmem>>, vector<8x1xf32>
    %25 = arith.subf %17, %18 : vector<8x1xf32>
    %26 = math.exp %25 : vector<8x1xf32>
    %27 = arith.mulf %24, %26 : vector<8x1xf32>
    %28 = arith.addf %27, %23 : vector<8x1xf32>
    %c0_13 = arith.constant 0 : index
    %c0_14 = arith.constant 0 : index
    %29 = vector.load %arg9[%c0_13, %c0_14] : memref<8x1xf32, #tpu.memory_space<vmem>>, vector<8x1xf32>
    tpu.vector_store %arg9[%c0_13, %c0_14], %28 {strides = array<i32>} : memref<8x1xf32, #tpu.memory_space<vmem>>, vector<8x1xf32>,
    %c0_15 = arith.constant 0 : index
    %c0_16 = arith.constant 0 : index
    %30 = vector.load %arg8[%c0_15, %c0_16] : memref<8x1xf32, #tpu.memory_space<vmem>>, vector<8x1xf32>
    tpu.vector_store %arg8[%c0_15, %c0_16], %18 {strides = array<i32>} : memref<8x1xf32, #tpu.memory_space<vmem>>, vector<8x1xf32>,
    %c0_17 = arith.constant 0 : index
    %c0_18 = arith.constant 0 : index
    %31 = vector.load %arg10[%c0_17, %c0_18] : memref<8x1xf32, #tpu.memory_space<vmem>>, vector<8x1xf32>
    %32 = vector.broadcast %0 : vector<8x1xi32> to vector<8x128xi32>
    %33 = arith.cmpi eq, %14, %32 : vector<8x128xi32>
    %cst_19 = arith.constant 0.000000e+00 : f32
    %34 = vector.broadcast %cst_19 : f32 to vector<8x128xf32>
    %35 = arith.select %33, %10, %34 : vector<8x128xi1>, vector<8x128xf32>
    %cst_20 = arith.constant dense<0.000000e+00> : vector<8xf32>
    %36 = vector.multi_reduction <add>, %35, %cst_20 [1] : vector<8x128xf32> to vector<8xf32>
    %37 = vector.shape_cast %36 : vector<8xf32> to vector<8x1xf32>
    %38 = arith.addf %31, %37 : vector<8x1xf32>
    %c0_21 = arith.constant 0 : index
    %c0_22 = arith.constant 0 : index
    %39 = vector.load %arg10[%c0_21, %c0_22] : memref<8x1xf32, #tpu.memory_space<vmem>>, vector<8x1xf32>
    tpu.vector_store %arg10[%c0_21, %c0_22], %38 {strides = array<i32>} : memref<8x1xf32, #tpu.memory_space<vmem>>, vector<8x1xf32>,
    %c0_i32_23 = arith.constant 0 : i32
    %40 = arith.cmpi eq, %arg0, %c0_i32_23 : i32
    %41 = arith.extui %40 : i1 to i32
    %c0_i32_24 = arith.constant 0 : i32
    %42 = arith.cmpi ne, %41, %c0_i32_24 : i32
    scf.if %42 {
      %51 = arith.sitofp %14 : vector<8x128xi32> to vector<8x128xf32>
      %52 = vector.broadcast %16 : vector<8x1xf32> to vector<8x128xf32>
      %53 = arith.cmpf oge, %10, %52 : vector<8x128xf32>
      %cst_29 = arith.constant 3.000000e+38 : f32
      %54 = vector.broadcast %cst_29 : f32 to vector<8x128xf32>
      %55 = arith.select %53, %51, %54 : vector<8x128xi1>, vector<8x128xf32>
      %cst_30 = arith.constant dense<0x7F800000> : vector<8xf32>
      %56 = vector.multi_reduction <minimumf>, %55, %cst_30 [1] : vector<8x128xf32> to vector<8xf32>
      %57 = vector.shape_cast %56 : vector<8xf32> to vector<8x1xf32>
      %58 = arith.cmpf ogt, %16, %17 : vector<8x1xf32>
      %c0_31 = arith.constant 0 : index
      %c0_32 = arith.constant 0 : index
      %59 = vector.load %arg11[%c0_31, %c0_32] : memref<8x1xf32, #tpu.memory_space<vmem>>, vector<8x1xf32>
      %60 = arith.select %58, %57, %59 : vector<8x1xi1>, vector<8x1xf32>
      %c0_33 = arith.constant 0 : index
      %c0_34 = arith.constant 0 : index
      %61 = vector.load %arg11[%c0_33, %c0_34] : memref<8x1xf32, #tpu.memory_space<vmem>>, vector<8x1xf32>
      tpu.vector_store %arg11[%c0_33, %c0_34], %60 {strides = array<i32>} : memref<8x1xf32, #tpu.memory_space<vmem>>, vector<8x1xf32>,
    } else {
    }
    %c0_i32_25 = arith.constant 0 : i32
    %43 = arith.cmpi eq, %arg1, %c0_i32_25 : i32
    %44 = arith.extui %43 : i1 to i32
    %c0_i32_26 = arith.constant 0 : i32
    %45 = arith.cmpi ne, %44, %c0_i32_26 : i32
    scf.if %45 {
      %c0_29 = arith.constant 0 : index
      %c0_30 = arith.constant 0 : index
      %51 = vector.load %arg8[%c0_29, %c0_30] : memref<8x1xf32, #tpu.memory_space<vmem>>, vector<8x1xf32>
      %c0_31 = arith.constant 0 : index
      %c0_32 = arith.constant 0 : index
      %52 = vector.load %arg9[%c0_31, %c0_32] : memref<8x1xf32, #tpu.memory_space<vmem>>, vector<8x1xf32>
      %53 = math.log %52 : vector<8x1xf32>
      %54 = arith.addf %51, %53 : vector<8x1xf32>
      %c0_33 = arith.constant 0 : index
      %c0_34 = arith.constant 0 : index
      %55 = vector.load %arg10[%c0_33, %c0_34] : memref<8x1xf32, #tpu.memory_space<vmem>>, vector<8x1xf32>
      %56 = arith.subf %54, %55 : vector<8x1xf32>
      %c0_35 = arith.constant 0 : index
      %c0_36 = arith.constant 0 : index
      %57 = vector.load %arg12[%c0_35, %c0_36] : memref<1x1xf32, #tpu.memory_space<vmem>>, vector<1x1xf32>
      %cst_37 = arith.constant dense<0.000000e+00> : vector<1xf32>
      %58 = vector.multi_reduction <add>, %56, %cst_37 [0] : vector<8x1xf32> to vector<1xf32>
      %59 = vector.shape_cast %58 : vector<1xf32> to vector<1x1xf32>
      %cst_38 = arith.constant 1.250000e-01 : f32
      %60 = vector.broadcast %cst_38 : f32 to vector<1x1xf32>
      %61 = arith.mulf %59, %60 : vector<1x1xf32>
      %62 = arith.addf %57, %61 : vector<1x1xf32>
      %c0_39 = arith.constant 0 : index
      %c0_40 = arith.constant 0 : index
      %63 = vector.load %arg12[%c0_39, %c0_40] : memref<1x1xf32, #tpu.memory_space<vmem>>, vector<1x1xf32>
      tpu.vector_store %arg12[%c0_39, %c0_40], %62 {strides = array<i32>} : memref<1x1xf32, #tpu.memory_space<vmem>>, vector<1x1xf32>,
    } else {
    }
    %c1_i32 = arith.constant 1 : i32
    %46 = arith.cmpi eq, %arg0, %c1_i32 : i32
    %c0_i32_27 = arith.constant 0 : i32
    %47 = arith.cmpi eq, %arg1, %c0_i32_27 : i32
    %48 = arith.andi %46, %47 : i1
    %49 = arith.extui %48 : i1 to i32
    %c0_i32_28 = arith.constant 0 : i32
    %50 = arith.cmpi ne, %49, %c0_i32_28 : i32
    scf.if %50 {
      %c0_29 = arith.constant 0 : index
      %c0_30 = arith.constant 0 : index
      %51 = vector.load %arg12[%c0_29, %c0_30] : memref<1x1xf32, #tpu.memory_space<vmem>>, vector<1x1xf32>
      %c0_31 = arith.constant 0 : index
      %c0_32 = arith.constant 0 : index
      %52 = vector.load %arg11[%c0_31, %c0_32] : memref<8x1xf32, #tpu.memory_space<vmem>>, vector<8x1xf32>
      %53 = arith.sitofp %0 : vector<8x1xi32> to vector<8x1xf32>
      %54 = arith.cmpf oeq, %52, %53 : vector<8x1xf32>
      %55 = arith.extui %54 : vector<8x1xi1> to vector<8x1xi32>
      %56 = arith.sitofp %55 : vector<8x1xi32> to vector<8x1xf32>
      %cst_33 = arith.constant dense<0.000000e+00> : vector<1xf32>
      %57 = vector.multi_reduction <add>, %56, %cst_33 [0] : vector<8x1xf32> to vector<1xf32>
      %58 = vector.shape_cast %57 : vector<1xf32> to vector<1x1xf32>
      %cst_34 = arith.constant 1.250000e-01 : f32
      %59 = vector.broadcast %cst_34 : f32 to vector<1x1xf32>
      %60 = arith.mulf %58, %59 : vector<1x1xf32>
      %cst_35 = arith.constant 0.000000e+00 : f32
      %61 = vector.broadcast %cst_35 : f32 to vector<1x1xf32>
      %c0_36 = arith.constant 0 : index
      %c0_37 = arith.constant 0 : index
      %62 = vector.load %arg3[%c0_36, %c0_37] : memref<1x8xi32, #tpu.memory_space<vmem>>, vector<1x8xi32>
      %63 = vector.broadcast %0 : vector<8x1xi32> to vector<8x8xi32>
      %64 = vector.broadcast %62 : vector<1x8xi32> to vector<8x8xi32>
      %65 = arith.cmpi eq, %63, %64 : vector<8x8xi32>
      %c0_38 = arith.constant 0 : index
      %c0_39 = arith.constant 0 : index
      %c0_40 = arith.constant 0 : index
      %66 = vector.load %arg5[%c0_38, %c0_39, %c0_40] : memref<1x8x32xf32, #tpu.memory_space<vmem>>, vector<1x8x32xf32>
      %67 = vector.shape_cast %66 : vector<1x8x32xf32> to vector<8x32xf32>
      %cst_41 = arith.constant dense<0.000000e+00> : vector<8x8xf32>
      %68 = tpu.matmul %67, %67, %cst_41 {dimension_numbers = #tpu.dot_dimension_numbers<[1], [1], [0], [0], [0, 0, 1, 0], [], []>} : vector<8x32xf32>, vector<8x32xf32>, vector<8x8xf32> -> vector<8x8xf32>
      %69 = arith.mulf %67, %67 : vector<8x32xf32>
      %cst_42 = arith.constant dense<0.000000e+00> : vector<8xf32>
      %70 = vector.multi_reduction <add>, %69, %cst_42 [1] : vector<8x32xf32> to vector<8xf32>
      %71 = vector.shape_cast %70 : vector<8xf32> to vector<8x1xf32>
      %cst_43 = arith.constant 1.000000e+00 : f32
      %72 = vector.broadcast %cst_43 : f32 to vector<1x32xf32>
      %cst_44 = arith.constant dense<0.000000e+00> : vector<1x8xf32>
      %73 = tpu.matmul %72, %69, %cst_44 {dimension_numbers = #tpu.dot_dimension_numbers<[1], [1], [0], [0], [0, 0, 1, 0], [], []>} : vector<1x32xf32>, vector<8x32xf32>, vector<1x8xf32> -> vector<1x8xf32>
      %74 = vector.broadcast %71 : vector<8x1xf32> to vector<8x8xf32>
      %75 = vector.broadcast %73 : vector<1x8xf32> to vector<8x8xf32>
      %76 = arith.addf %74, %75 : vector<8x8xf32>
      %cst_45 = arith.constant 2.000000e+00 : f32
      %77 = vector.broadcast %cst_45 : f32 to vector<8x8xf32>
      %78 = arith.mulf %77, %68 : vector<8x8xf32>
      %79 = arith.subf %76, %78 : vector<8x8xf32>
      %cst_46 = arith.constant 9.99999996E-13 : f32
      %80 = vector.broadcast %cst_46 : f32 to vector<8x8xf32>
      %81 = arith.maximumf %79, %80 : vector<8x8xf32>
      %82 = math.sqrt %81 : vector<8x8xf32>
      %cst_47 = arith.constant -1.000000e+30 : f32
      %83 = vector.broadcast %cst_47 : f32 to vector<8x8xf32>
      %84 = arith.select %65, %82, %83 : vector<8x8xi1>, vector<8x8xf32>
      %cst_48 = arith.constant dense<0xFF800000> : vector<8xf32>
      %85 = vector.multi_reduction <maximumf>, %84, %cst_48 [1] : vector<8x8xf32> to vector<8xf32>
      %86 = vector.shape_cast %85 : vector<8xf32> to vector<8x1xf32>
      %cst_49 = arith.constant 1.000000e+30 : f32
      %87 = vector.broadcast %cst_49 : f32 to vector<8x8xf32>
      %88 = arith.select %65, %87, %82 : vector<8x8xi1>, vector<8x8xf32>
      %cst_50 = arith.constant dense<0x7F800000> : vector<8xf32>
      %89 = vector.multi_reduction <minimumf>, %88, %cst_50 [1] : vector<8x8xf32> to vector<8xf32>
      %90 = vector.shape_cast %89 : vector<8xf32> to vector<8x1xf32>
      %91 = arith.subf %86, %90 : vector<8x1xf32>
      %cst_51 = arith.constant 5.000000e-01 : f32
      %92 = vector.broadcast %cst_51 : f32 to vector<8x1xf32>
      %93 = arith.addf %91, %92 : vector<8x1xf32>
      %cst_52 = arith.constant 0.000000e+00 : f32
      %94 = vector.broadcast %cst_52 : f32 to vector<8x1xf32>
      %95 = arith.maximumf %93, %94 : vector<8x1xf32>
      %cst_53 = arith.constant dense<0.000000e+00> : vector<1xf32>
      %96 = vector.multi_reduction <add>, %95, %cst_53 [0] : vector<8x1xf32> to vector<1xf32>
      %97 = vector.shape_cast %96 : vector<1xf32> to vector<1x1xf32>
      %cst_54 = arith.constant 1.250000e-01 : f32
      %98 = vector.broadcast %cst_54 : f32 to vector<1x1xf32>
      %99 = arith.mulf %97, %98 : vector<1x1xf32>
      %100 = arith.addf %61, %99 : vector<1x1xf32>
      %101 = arith.cmpf ogt, %90, %86 : vector<8x1xf32>
      %102 = arith.extui %101 : vector<8x1xi1> to vector<8x1xi32>
      %103 = arith.sitofp %102 : vector<8x1xi32> to vector<8x1xf32>
      %cst_55 = arith.constant dense<0.000000e+00> : vector<1xf32>
      %104 = vector.multi_reduction <add>, %103, %cst_55 [0] : vector<8x1xf32> to vector<1xf32>
      %105 = vector.shape_cast %104 : vector<1xf32> to vector<1x1xf32>
      %cst_56 = arith.constant 1.250000e-01 : f32
      %106 = vector.broadcast %cst_56 : f32 to vector<1x1xf32>
      %107 = arith.mulf %105, %106 : vector<1x1xf32>
      %c0_57 = arith.constant 0 : index
      %c0_58 = arith.constant 0 : index
      %c0_59 = arith.constant 0 : index
      %108 = vector.load %arg6[%c0_57, %c0_58, %c0_59] : memref<3x8x32xf32, #tpu.memory_space<vmem>>, vector<1x8x32xf32>
      %109 = vector.shape_cast %108 : vector<1x8x32xf32> to vector<8x32xf32>
      %c1 = arith.constant 1 : index
      %c0_60 = arith.constant 0 : index
      %c0_61 = arith.constant 0 : index
      %110 = vector.load %arg6[%c1, %c0_60, %c0_61] : memref<3x8x32xf32, #tpu.memory_space<vmem>>, vector<1x8x32xf32>
      %111 = vector.shape_cast %110 : vector<1x8x32xf32> to vector<8x32xf32>
      %c2 = arith.constant 2 : index
      %c0_62 = arith.constant 0 : index
      %c0_63 = arith.constant 0 : index
      %112 = vector.load %arg6[%c2, %c0_62, %c0_63] : memref<3x8x32xf32, #tpu.memory_space<vmem>>, vector<1x8x32xf32>
      %113 = vector.shape_cast %112 : vector<1x8x32xf32> to vector<8x32xf32>
      %114 = arith.subf %113, %109 : vector<8x32xf32>
      %115 = arith.subf %113, %111 : vector<8x32xf32>
      %116 = arith.mulf %114, %114 : vector<8x32xf32>
      %cst_64 = arith.constant dense<0.000000e+00> : vector<8xf32>
      %117 = vector.multi_reduction <add>, %116, %cst_64 [1] : vector<8x32xf32> to vector<8xf32>
      %118 = vector.shape_cast %117 : vector<8xf32> to vector<8x1xf32>
      %cst_65 = arith.constant dense<0.000000e+00> : vector<1xf32>
      %119 = vector.multi_reduction <add>, %118, %cst_65 [0] : vector<8x1xf32> to vector<1xf32>
      %120 = vector.shape_cast %119 : vector<1xf32> to vector<1x1xf32>
      %121 = arith.mulf %115, %115 : vector<8x32xf32>
      %cst_66 = arith.constant dense<0.000000e+00> : vector<8xf32>
      %122 = vector.multi_reduction <add>, %121, %cst_66 [1] : vector<8x32xf32> to vector<8xf32>
      %123 = vector.shape_cast %122 : vector<8xf32> to vector<8x1xf32>
      %cst_67 = arith.constant dense<0.000000e+00> : vector<1xf32>
      %124 = vector.multi_reduction <add>, %123, %cst_67 [0] : vector<8x1xf32> to vector<1xf32>
      %125 = vector.shape_cast %124 : vector<1xf32> to vector<1x1xf32>
      %126 = math.sqrt %120 : vector<1x1xf32>
      %127 = math.sqrt %125 : vector<1x1xf32>
      %128 = arith.addf %126, %127 : vector<1x1xf32>
      %cst_68 = arith.constant 1.000000e+00 : f32
      %129 = vector.broadcast %cst_68 : f32 to vector<1x1xf32>
      %130 = arith.mulf %129, %100 : vector<1x1xf32>
      %cst_69 = arith.constant 1.000000e+00 : f32
      %131 = vector.broadcast %cst_69 : f32 to vector<1x1xf32>
      %132 = arith.mulf %131, %51 : vector<1x1xf32>
      %133 = arith.addf %130, %132 : vector<1x1xf32>
      %cst_70 = arith.constant 1.000000e-01 : f32
      %134 = vector.broadcast %cst_70 : f32 to vector<1x1xf32>
      %135 = arith.mulf %134, %128 : vector<1x1xf32>
      %136 = arith.addf %133, %135 : vector<1x1xf32>
      %137 = arith.maximumf %107, %60 : vector<1x1xf32>
      %138 = tpu.iota {dimensions = array<i32: 1>} : vector<1x8xi32>
      %c0_i32_71 = arith.constant 0 : i32
      %139 = vector.broadcast %c0_i32_71 : i32 to vector<1x8xi32>
      %140 = arith.cmpi eq, %138, %139 : vector<1x8xi32>
      %cst_72 = arith.constant 0.000000e+00 : f32
      %141 = vector.shape_cast %136 : vector<1x1xf32> to vector<1x1xf32>
      %142 = vector.broadcast %141 : vector<1x1xf32> to vector<1x8xf32>
      %143 = vector.broadcast %cst_72 : f32 to vector<1x8xf32>
      %144 = arith.select %140, %142, %143 : vector<1x8xi1>, vector<1x8xf32>
      %c1_i32_73 = arith.constant 1 : i32
      %145 = vector.broadcast %c1_i32_73 : i32 to vector<1x8xi32>
      %146 = arith.cmpi eq, %138, %145 : vector<1x8xi32>
      %cst_74 = arith.constant 0.000000e+00 : f32
      %147 = vector.shape_cast %137 : vector<1x1xf32> to vector<1x1xf32>
      %148 = vector.broadcast %147 : vector<1x1xf32> to vector<1x8xf32>
      %149 = vector.broadcast %cst_74 : f32 to vector<1x8xf32>
      %150 = arith.select %146, %148, %149 : vector<1x8xi1>, vector<1x8xf32>
      %151 = arith.addf %144, %150 : vector<1x8xf32>
      %c2_i32 = arith.constant 2 : i32
      %152 = vector.broadcast %c2_i32 : i32 to vector<1x8xi32>
      %153 = arith.cmpi eq, %138, %152 : vector<1x8xi32>
      %cst_75 = arith.constant 0.000000e+00 : f32
      %154 = vector.shape_cast %107 : vector<1x1xf32> to vector<1x1xf32>
      %155 = vector.broadcast %154 : vector<1x1xf32> to vector<1x8xf32>
      %156 = vector.broadcast %cst_75 : f32 to vector<1x8xf32>
      %157 = arith.select %153, %155, %156 : vector<1x8xi1>, vector<1x8xf32>
      %158 = arith.addf %151, %157 : vector<1x8xf32>
      %c3_i32 = arith.constant 3 : i32
      %159 = vector.broadcast %c3_i32 : i32 to vector<1x8xi32>
      %160 = arith.cmpi eq, %138, %159 : vector<1x8xi32>
      %cst_76 = arith.constant 0.000000e+00 : f32
      %161 = vector.shape_cast %60 : vector<1x1xf32> to vector<1x1xf32>
      %162 = vector.broadcast %161 : vector<1x1xf32> to vector<1x8xf32>
      %163 = vector.broadcast %cst_76 : f32 to vector<1x8xf32>
      %164 = arith.select %160, %162, %163 : vector<1x8xi1>, vector<1x8xf32>
      %165 = arith.addf %158, %164 : vector<1x8xf32>
      %c4_i32 = arith.constant 4 : i32
      %166 = vector.broadcast %c4_i32 : i32 to vector<1x8xi32>
      %167 = arith.cmpi eq, %138, %166 : vector<1x8xi32>
      %cst_77 = arith.constant 0.000000e+00 : f32
      %168 = vector.shape_cast %100 : vector<1x1xf32> to vector<1x1xf32>
      %169 = vector.broadcast %168 : vector<1x1xf32> to vector<1x8xf32>
      %170 = vector.broadcast %cst_77 : f32 to vector<1x8xf32>
      %171 = arith.select %167, %169, %170 : vector<1x8xi1>, vector<1x8xf32>
      %172 = arith.addf %165, %171 : vector<1x8xf32>
      %c5_i32 = arith.constant 5 : i32
      %173 = vector.broadcast %c5_i32 : i32 to vector<1x8xi32>
      %174 = arith.cmpi eq, %138, %173 : vector<1x8xi32>
      %cst_78 = arith.constant 0.000000e+00 : f32
      %175 = vector.shape_cast %51 : vector<1x1xf32> to vector<1x1xf32>
      %176 = vector.broadcast %175 : vector<1x1xf32> to vector<1x8xf32>
      %177 = vector.broadcast %cst_78 : f32 to vector<1x8xf32>
      %178 = arith.select %174, %176, %177 : vector<1x8xi1>, vector<1x8xf32>
      %179 = arith.addf %172, %178 : vector<1x8xf32>
      %c6_i32 = arith.constant 6 : i32
      %180 = vector.broadcast %c6_i32 : i32 to vector<1x8xi32>
      %181 = arith.cmpi eq, %138, %180 : vector<1x8xi32>
      %cst_79 = arith.constant 0.000000e+00 : f32
      %182 = vector.shape_cast %128 : vector<1x1xf32> to vector<1x1xf32>
      %183 = vector.broadcast %182 : vector<1x1xf32> to vector<1x8xf32>
      %184 = vector.broadcast %cst_79 : f32 to vector<1x8xf32>
      %185 = arith.select %181, %183, %184 : vector<1x8xi1>, vector<1x8xf32>
      %186 = arith.addf %179, %185 : vector<1x8xf32>
      %c0_80 = arith.constant 0 : index
      %c0_81 = arith.constant 0 : index
      %187 = vector.load %arg7[%c0_80, %c0_81] : memref<1x8xf32, #tpu.memory_space<vmem>>, vector<1x8xf32>
      tpu.vector_store %arg7[%c0_80, %c0_81], %186 {strides = array<i32>} : memref<1x8xf32, #tpu.memory_space<vmem>>, vector<1x8xf32>,
    } else {
    }
    return
  }
  func.func @transform_0(%arg0: i32, %arg1: i32) -> (i32, i32) {
    %c0_i32 = arith.constant 0 : i32
    %c0_i32_0 = arith.constant 0 : i32
    %c0_i32_1 = arith.constant 0 : i32
    return %c0_i32, %c0_i32_0 : i32, i32
  }
  func.func @transform_1(%arg0: i32, %arg1: i32) -> (i32, i32) {
    %c0_i32 = arith.constant 0 : i32
    %c0_i32_0 = arith.constant 0 : i32
    %c0_i32_1 = arith.constant 0 : i32
    return %c0_i32, %c0_i32_0 : i32, i32
  }
  func.func @transform_2(%arg0: i32, %arg1: i32) -> (i32, i32, i32) {
    %c0_i32 = arith.constant 0 : i32
    %c0_i32_0 = arith.constant 0 : i32
    return %arg0, %c0_i32, %arg1 : i32, i32, i32
  }
  func.func @transform_3(%arg0: i32, %arg1: i32) -> (i32, i32, i32) {
    %c0_i32 = arith.constant 0 : i32
    %c0_i32_0 = arith.constant 0 : i32
    %c0_i32_1 = arith.constant 0 : i32
    %c0_i32_2 = arith.constant 0 : i32
    return %c0_i32, %c0_i32_0, %c0_i32_1 : i32, i32, i32
  }
  func.func @transform_4(%arg0: i32, %arg1: i32) -> (i32, i32, i32) {
    %c0_i32 = arith.constant 0 : i32
    %c0_i32_0 = arith.constant 0 : i32
    %c0_i32_1 = arith.constant 0 : i32
    %c0_i32_2 = arith.constant 0 : i32
    return %c0_i32, %c0_i32_0, %c0_i32_1 : i32, i32, i32
  }
  func.func @transform_5(%arg0: i32, %arg1: i32) -> (i32, i32) {
    %c0_i32 = arith.constant 0 : i32
    %c0_i32_0 = arith.constant 0 : i32
    %c0_i32_1 = arith.constant 0 : i32
    return %c0_i32, %c0_i32_0 : i32, i32
  }
}

</mosaic_0001>

<bundles_post_ra>
// kernel: tpu_custom_call.1
= control target key start
LH: loop header
LB: loop body
LE: loop exit
PB: predicated region body
PF: predicated region fallthrough
CT: control target
= control target key end

     0   :  { %10 = vsyncpa [#allocation8], 0  ;;  %s1264_s0 = inlined_call_operand.vmem [shape: s32[8,1], index: 0, kind: input, shape index: {}]   ;;  %s1265_s1 = inlined_call_operand.vmem [shape: s32[1,8], index: 1, kind: input, shape index: {}]   ;;  %s1266_s2 = inlined_call_operand.hbm [shape: f32[2,8,128], index: 2, kind: input, shape index: {}]   ;;  %s1267_s3 = inlined_call_operand.vmem [shape: f32[1,8,32], index: 3, kind: input, shape index: {}]   ;;  %s1268_s4 = inlined_call_operand.hbm [shape: f32[3,8,32], index: 4, kind: input, shape index: {}]   ;;  %s1269_s5 = inlined_call_operand.hbm [shape: f32[1,8], index: 5, kind: output, shape index: {}]  }
   0x1   :  { %12 = vsyncpa [#allocation8 + $0x1], 0 }
   0x2   :  { %13 = vsyncpa [#allocation11], 0 }
   0x3   :  { %14 = vsyncpa [#allocation9], 0  ;;  %s1066_s18 = smov 0   ;;  %s1068_s19 = smov 0  }
   0x4   :  { %s1070_s20 = smov 0   ;;  %s1072_s21 = smov 0  }
   0x5   :  { %s1074_s22 = smov 0   ;;  %s1076_s23 = smov 0  }
   0x6 LB: > { %s747_s24 = sadd.s32 4294967295, %s1021_s23   ;;  %p96_p0 = scmp.ne.s32.totalorder %s1005_s19, %s1001_s18  ;;  %s1021_s23 = sphi %s1076_s23, %s20_s23   ;;  %s1017_s22 = sphi %s1074_s22, %s1280_s22   ;;  %s1013_s21 = sphi %s1072_s21, %s1279_s21   ;;  %s1009_s20 = sphi %s1070_s20, %s1278_s20   ;;  %s1005_s19 = sphi %s1068_s19, %s1277_s19   ;;  %s1001_s18 = sphi %s1066_s18, %s1276_s18  }
   0x7   : > { %p1098_p1 = scmp.eq.s32.totalorder %s747_s24, 0  ;;  %p748_p2 = scmp.ge.s32.totalorder %s1021_s23, 1 }
   0x8   : > { %p170_p3 = scmp.lt.s32.totalorder %s1021_s23, 3  ;;  %s1023_s28 = smov [#allocation10]  }
   0x9   : > { %p1106_p4 = por %p1098_p1, %p96_p0  ;;  %s191_s29 = sshll.u32 %s1023_s28, 4  ;;  %s192_s29 = int_to_ptr.vmem [resolvable:$true] %s191_s29 }
   0xa   : > { %p1110_p5 = pnand %p748_p2, %p170_p3  ;;  %s32_s6 = sadd.s32 1, %s1017_s22 }
   0xb   : > { %s896_s7 = scalar_lea.vmem %s192_s29, 384  ;;  %p904_p12 = scmp.lt.s32.totalorder %s192_s29, %s192_s29 }
   0xc   : > { %p796_p6 = pneg %p1110_p5  ;;  %p897_p9 = scmp.ne.s32.totalorder %s192_s29, %s896_s7 }
   0xd   : > { %p905_p13 = scmp.lt.s32.totalorder %s896_s7, %s896_s7 }
   0xe   : > { %p1118_p7 = pnand %p796_p6, %p1098_p1 }
   0xf   : > { %p906_p0 = por %p905_p13, %p904_p12 }
  0x10   : > { %p887_p8 = pneg %p1118_p7 }
  0x12   : > { %p899_p10 = pnand %p897_p9, %p887_p8 }
  0x14   : > { %p900_p11 = pneg %p899_p10 }
  0x16   : > { %p907_p2 = pnand %p906_p0, %p900_p11 }
  0x18   : > { %910 = shalt.err (!%p907_p2)
}
  0x19   : > { %s1024_s8 = smov 128   ;;  %s1025_s9 = smov 8  }
  0x1a   : > { %799 = dma.hbm_to_vmem [thread:$0]  (!%p1118_p7), %s1268_s4, 384, %s192_s29, [#allocation11], %s1024_s8, %s1024_s8, %s1025_s9  }
  0x1b   : > { %p34_p3 = scmp.ge.s32.totalorder %s32_s6, 2  ;;  %s83_s12 = sadd.s32 1, %s1009_s20 }
  0x1c   : > { %p90_p6 = scmp.ne.s32.totalorder %s1009_s20, %s1005_s19  ;;  %p91_p8 = scmp.eq.s32.totalorder %s1021_s23, 0 }
  0x1d   : > { %s1282_s6 = smov (%p34_p3, %s32_s6), 0  ;;  %p805_p10 = scmp.lt.s32.totalorder %s1021_s23, 2 }
  0x1e   : > { %p92_p9 = por %p91_p8, %p90_p6  ;;  %s78_s13 = ssub.s32 %s1017_s22, %s1282_s6 }
  0x1f   : > { %s205_s14 = sand.u32 1, %s1009_s20   ;;  %p81_p11 = scmp.eq.s32.totalorder %s78_s13, 0 }
  0x20   : > { %s751_s15 = sshll.u32 %s205_s14, 3  ;;  %s752_s16 = sshll.u32 %s1017_s22, 7 }
  0x21   : > { %s1142_s17 = scalar_select %p81_p11, %s1009_s20, %s83_s12  }
  0x22   : > { %s215_s29 = scalar_lea.hbm %s1266_s2, %s752_s16  ;;  %s209_s30 = scalar_lea.vmem [#allocation7], %s751_s15 }
  0x23   : > { %s217_s7 = sshll.u32 %s209_s30, 4  ;;  %p1147_p7 = pnand %p805_p10, %p92_p9  ;;  %s218_s7 = int_to_ptr.vmem [resolvable:$true] %s217_s7 }
  0x24   : > { %s206_s9 = scalar_lea.sflag [#allocation8], %s205_s14  ;;  %s924_s10 = scalar_lea.vmem %s218_s7, 128 }
  0x25   : > { %p913_p12 = pneg %p1147_p7  ;;  %p925_p13 = scmp.ne.s32.totalorder %s218_s7, %s924_s10 }
  0x26   : > { %s1026_s11 = smov [#allocation7]  }
  0x27   : > { %p927_p0 = pnand %p925_p13, %p913_p12  ;;  %s929_s12 = sshll.u32 %s1026_s11, 4  ;;  %s930_s12 = int_to_ptr.vmem [resolvable:$false] %s929_s12 }
  0x28   : > { %s931_s13 = scalar_lea.vmem %s930_s12, 256  ;;  %p932_p3 = scmp.lt.s32.totalorder %s218_s7, %s930_s12 }
  0x29   : > { %p928_p2 = pneg %p927_p0  ;;  %p933_p6 = scmp.lt.s32.totalorder %s931_s13, %s924_s10 }
  0x2b   : > { %p934_p8 = por %p933_p6, %p932_p3 }
  0x2d   : > { %p935_p9 = pnand %p934_p8, %p928_p2 }
  0x2f   : > { %938 = shalt.err (!%p935_p9)
}
  0x30   : > { %803 = dma.hbm_to_vmem [thread:$0]  (!%p1147_p7), %s215_s29, 128, %s218_s7, %s206_s9  }
  0x31   : > { %226 = sbr.rel (%p1110_p5) target bundleno = 1180 (0x49c), region = 40  ;;  %s228_s14 = sand.u32 (!%p1110_p5), 1, %s1005_s19  }
  0x32   : > { %s754_s15 = sshll.u32 (!%p1110_p5), %s228_s14, 3  ;;  %s229_s16 = scalar_lea.sflag (!%p1110_p5), [#allocation8], %s228_s14 }
  0x33   : > { %s232_s18 = scalar_lea.vmem (!%p1110_p5), [#allocation7], %s754_s15 }
  0x36   : > { %988 = dma.done.wait (%p1106_p4), %s229_s16, 128  }
  0x37   : > { %990 = vsyncadd (%p1106_p4), %s229_s16, 4294967168 }
  0x38   : > { %992 = dma.done.wait (%p1098_p1), [#allocation11], 384  }
  0x39   : > { %994 = vsyncadd (%p1098_p1), [#allocation11], 4294966912  ;;  %vm263_vm0 = vcmask 7168   ;;  %p267_p5 = scmp.eq.s32.totalorder %s1013_s21, 0  ;;  %v1027_v0 = vmov -inf   ;;  %v1028_v1 = vmov 0.0  }
  0x3a   : > { %264 = vst.msk [vmem:[#allocation2] sm:$0xff] %vm263_vm0, %v1027_v0  ;;  %265 = vst.msk [vmem:[#allocation3] sm:$0xff] %vm263_vm0, %v1028_v1  ;;  %v1173_v2 = vld [vmem:[%s1264_s0] sm:$0xff]  ;;  %vm272_vm1 = vcmask (%p267_p5), 0   ;;  %v1029_v3 = vmov (%p267_p5), 0.0  }
  0x3b   : > { %266 = vst.msk [vmem:[#allocation4] sm:$0xff] %vm263_vm0, %v1028_v1  ;;  %271 = sbr.rel (!%p267_p5) target bundleno = 64 (0x40), region = 56  ;;  %275 = vst.msk [vmem:[#allocation5] sm:$0xff] (%p267_p5), %vm263_vm0, %v1029_v3 }
  0x3c   : > { %273 = vst.msk [vmem:[#allocation6] sm:$0x1] (%p267_p5), %vm272_vm1, %v1029_v3 }
  0x40 PF: > { %v276_v4 = vld [vmem:[%s232_s18] sm:$0xff]  ;;  %v1030_v5 = vmov 0   ;;  %v277_v13 = vlaneseq  ;;  %p757_p1 = scmp.ne.s32.totalorder %s1013_s21, 0 }
  0x41   : > { %282 = vmax.xlane.f32.xlu0 %v276_v4  ;;  %870 = vset.pattern.permute.xlu1 %v1030_v5  ;;  %v284_v6 = vld [vmem:[#allocation2] sm:$0xff]  ;;  %v296_v20 = vld [vmem:[#allocation3] sm:$0xff] }
  0x42   : > { %869 = vset.pattern.permute.xlu0 %v1030_v5  ;;  %307 = vperm.xlu1 %870, %v1173_v2   ;;  %v1179_v14 = vand.u32 127, %v277_v13  ;;  %v305_v24 = vld [vmem:[#allocation4] sm:$0xff] }
  0xbd   : > { %v1181_v15 = vpop.permute.xlu1 %307 }
  0xbe   : > { %vm309_vm2 = vcmp.eq.s32.totalorder %v1179_v14, %v1181_v15 }
  0xbf   : > { %v310_v17 = vsel %vm309_vm2, %v276_v4, 0.0 }
  0xca   : > { %v283_v7 = vpop.xlane.xlu0 %282 }
  0xcb   : > { %v285_v8 = vmax.f32 %v284_v6, %v283_v7 }
  0xcd   : > { %v297_v9 = vsub.f32 %v284_v6, %v285_v8  ;;  %304 = vst.msk [vmem:[#allocation2] sm:$0xff] %vm263_vm0, %v285_v8  ;;  %288 = vperm.xlu0 %869, %v285_v8  }
  0xcf   : > { %v298_v18 = vmul.f32 1.442695, %v297_v9 }
 0x148   : > { %v289_v10 = vpop.permute.xlu0 %288 }
 0x149   : > { %v291_v11 = vsub.f32 %v276_v4, %v289_v10 }
 0x14b   : > { %v292_v12 = vmul.f32 1.442695, %v291_v11 }
 0x14d   : > { %871 = vpow2.f32 %v292_v12 }
 0x14e   : > { %873 = vpow2.f32 %v298_v18 }
 0x15a   : > { %v872_v16 = vpop.eup %871 }
 0x15b   : > { %294 = vadd.xlane.f32.xlu1 %v872_v16  ;;  %v874_v19 = vpop.eup %873 }
 0x15c   : > { %v300_v21 = vmul.f32 %v874_v19, %v296_v20 }
 0x15f   : > { %311 = vadd.xlane.f32.xlu1 %v310_v17 }
 0x1e4   : > { %v295_v22 = vpop.xlane.xlu1 %294 }
 0x1e5   : > { %v301_v23 = vadd.f32 %v300_v21, %v295_v22 }
 0x1e7   : > { %303 = vst.msk [vmem:[#allocation3] sm:$0xff] %vm263_vm0, %v301_v23  ;;  %317 = sbr.rel (%p757_p1) target bundleno = 635 (0x27b), region = 60 }
 0x1e8   : > { %v312_v25 = vpop.xlane.xlu1 %311 }
 0x1e9   : > { %v313_v26 = vadd.f32 %v312_v25, %v305_v24 }
 0x1eb   : > { %314 = vst.msk [vmem:[#allocation4] sm:$0xff] %vm263_vm0, %v313_v26 }
 0x1ec   : > { %v318_v27 = vcvt.s32.f32 %v1179_v14  ;;  %vm319_vm3 = vcmp.ge.f32.partialorder %v276_v4, %v283_v7  ;;  %vm323_vm4 = vcmp.gt.f32.partialorder %v283_v7, %v284_v6  ;;  %v324_v29 = vld [vmem:[#allocation5] sm:$0xff] }
 0x1ee   : > { %v320_v28 = vsel %vm319_vm3, %v318_v27, 3e+38 }
 0x1ef   : > { %321 = vmin.xlane.f32.xlu0 %v320_v28 }
 0x278   : > { %v322_v30 = vpop.xlane.xlu0 %321 }
 0x279   : > { %v325_v31 = vsel %vm323_vm4, %v322_v30, %v324_v29 }
 0x27a   : > { %326 = vst.msk [vmem:[#allocation5] sm:$0xff] %vm263_vm0, %v325_v31 }
 0x27b PF: > { %p349_p4 = scmp.eq.s32.totalorder %s1013_s21, 1  ;;  %v330_v34 = vld [vmem:[#allocation2] sm:$0xff]  ;;  %vm347_vm5 = vcmask 0  }
 0x27c   : > { %v337_v46 = vld [vmem:[#allocation6] sm:$0x1]  ;;  %v374_v49 = vld [vmem:[%s1267_s3] sm:$0xff] (%p349_p4)  ;;  %vm375_vm6 = vcmask (%p349_p4), 261120   ;;  %v1031_v51 = vmov (%p349_p4), 0.0   ;;  %v578_v53 = vld [vmem:[#allocation10 + $0x10] sm:$0xff] (%p349_p4) }
 0x27d   : > { %v331_v32 = vld [vmem:[#allocation3] sm:$0xff]  ;;  %v576_v50 = vld [vmem:[#allocation10 + $0x8] sm:$0xff] (%p349_p4)  ;;  %776 = vmatprep.subr.mxu0 (%p349_p4), %v1031_v51  ;;  %781 = vmatprep.subr.mxu1 (%p349_p4), %v1031_v51  ;;  %v449_v52 = vmul.f32 (%p349_p4), %v374_v49, %v374_v49  ;;  %v574_v54 = vld [vmem:[#allocation10] sm:$0xff] (%p349_p4)  ;;  %vm1032_vm7 = vmmov (%p349_p4), 0   ;;  %v1033_v60 = vmov (%p349_p4), 1.0   ;;  %v530_v63 = vshrl.u32 (%p349_p4), %v277_v13, 7 }
 0x27e   : > { %875 = vlog2.f32 %v331_v32  ;;  %777 = vmatpush3.xpose.msk.msra.mxu0 (%p349_p4), %vm375_vm6, %v374_v49  ;;  %778 = vmatprep.mubr.msk.f32.mxu0 (%p349_p4), %vm1032_vm7, %v1031_v51  ;;  %v580_v55 = vsub.f32 (%p349_p4), %v578_v53, %v576_v50  ;;  %v579_v56 = vsub.f32 (%p349_p4), %v578_v53, %v574_v54  ;;  %v760_v12 = vld [vmem:[%s1265_s1] ss:$0 sm:$0xff] (%p349_p4)  ;;  %vm545_vm11 = vcmask (%p349_p4), 64512  }
 0x27f   : > { %782 = vmatpush3.xpose.msk.msra.mxu1 (%p349_p4), %vm375_vm6, %v449_v52  ;;  %783 = vmatprep.mubr.msk.f32.mxu1 (%p349_p4), %vm1032_vm7, %v1031_v51  ;;  %v450_v57 = vsel (%p349_p4), %vm375_vm6, %v449_v52, 0.0  ;;  %v1209_v0 = vsub.s32 (%p349_p4), 0, %v530_v63  ;;  %vm373_vm8 = vcmp.eq.s32.totalorder (%p349_p4), %v1181_v15, %v760_v12  ;;  %v1034_v24 = vmov (%p349_p4), 0  }
 0x280   : > { %451 = vadd.xlane.f32.xlu0 (%p349_p4), %v450_v57  ;;  %v591_v58 = vmul.f32 (%p349_p4), %v580_v55, %v580_v55  ;;  %v581_v59 = vmul.f32 (%p349_p4), %v579_v56, %v579_v56  ;;  %877 = vset.pattern.permute.xlu1 (%p349_p4), %v1034_v24  ;;  %v356_v32 = vcvt.s32.f32 (%p349_p4), %v1173_v2  ;;  %vm631_vm2 = vcmp.eq.s32.totalorder (%p349_p4), %v1179_v14, 1 }
 0x281   : > { %v335_v36 = vld [vmem:[#allocation4] sm:$0xff]  ;;  %779 = vmatmul.mubr.msk.f32.vlgmr.msra.gmra.mxu0 (%p349_p4), %vm375_vm6, %v374_v49  ;;  %878 = vset.pattern.permute.xlu0 (%p349_p4), %v1034_v24  ;;  %vm620_vm3 = vcmp.eq.s32.totalorder (%p349_p4), %v1179_v14, 0  ;;  %vm639_vm4 = vcmp.eq.s32.totalorder (%p349_p4), %v1179_v14, 2  ;;  %vm653_vm7 = vcmp.eq.s32.totalorder (%p349_p4), %v1179_v14, 5 }
 0x282   : > { %784 = vmatmul.mubr.msk.f32.vlgmr.msra.gmra.mxu1 (%p349_p4), %vm375_vm6, %v1033_v60  ;;  %v592_v61 = vsel (%p349_p4), %vm375_vm6, %v591_v58, 0.0  ;;  %v582_v62 = vsel (%p349_p4), %vm375_vm6, %v581_v59, 0.0  ;;  %vm650_vm6 = vcmp.eq.s32.totalorder (%p349_p4), %v1179_v14, 4 }
 0x283   : > { %593 = vadd.xlane.f32.xlu1 (%p349_p4), %v592_v61 }
 0x284   : > { %583 = vadd.xlane.f32.xlu0 (%p349_p4), %v582_v62 }
 0x28b   : > { %v876_v33 = vpop.eup %875 }
 0x28c   : > { %v333_v35 = vmul.f32 0.6931472, %v876_v33  ;;  %v355_v33 = vld [vmem:[#allocation5] sm:$0xff] (%p349_p4) }
 0x28d   : > { %vm357_vm12 = vcmp.eq.f32.partialorder (%p349_p4), %v355_v33, %v356_v32 }
 0x28e   : > { %v334_v37 = vadd.f32 %v333_v35, %v330_v34 }
 0x290   : > { %v336_v38 = vsub.f32 %v334_v37, %v335_v36 }
 0x292   : > { %v338_v39 = vsel %vm263_vm0, %v336_v38, 0.0  ;;  %v759_v38 = vsel (%p349_p4), %vm357_vm12, 1.0, %v1031_v51 }
 0x293   : > { %v339_v40 = vrot.slane %v338_v39, 4 }
 0x295   : > { %v340_v41 = vadd.f32 %v339_v40, %v338_v39  ;;  %v360_v40 = vsel (%p349_p4), %vm263_vm0, %v759_v38, 0.0 }
 0x297   : > { %v341_v42 = vrot.slane %v340_v41, 2 }
 0x299   : > { %v342_v43 = vadd.f32 %v341_v42, %v340_v41  ;;  %v361_v42 = vrot.slane (%p349_p4), %v360_v40, 4 }
 0x29b   : > { %v343_v44 = vrot.slane %v342_v43, 1 }
 0x29d   : > { %v344_v45 = vadd.f32 %v343_v44, %v342_v43  ;;  %v362_v43 = vadd.f32 (%p349_p4), %v361_v42, %v360_v40 }
 0x29f   : > { %v345_v47 = vmul.f32 0.125, %v344_v45  ;;  %353 = sbr.rel (!%p349_p4) target bundleno = 1165 (0x48d), region = 68  ;;  %v363_v44 = vrot.slane (%p349_p4), %v362_v43, 2 }
 0x2a1   : > { %v346_v48 = vadd.f32 %v345_v47, %v337_v46  ;;  %v364_v47 = vadd.f32 (%p349_p4), %v363_v44, %v362_v43 }
 0x2a3   : > { %348 = vst.msk [vmem:[#allocation6] sm:$0x1] %vm347_vm5, %v346_v48  ;;  %v365_v56 = vrot.slane (%p349_p4), %v364_v47, 1  ;;  %vm642_vm5 = vcmp.eq.s32.totalorder (%p349_p4), %v1179_v14, 3 }
 0x2a5   : > { %v366_v63 = vadd.f32 %v365_v56, %v364_v47 }
 0x309   : > { %v452_v4 = vpop.xlane.xlu0 %451 }
 0x30c   : > { %v594_v26 = vpop.xlane.xlu1 %593 }
 0x30d   : > { %v584_v25 = vpop.xlane.xlu0 %583  ;;  %v595_v28 = vrot.slane %v594_v26, 4 }
 0x30e   : > { %v585_v27 = vrot.slane %v584_v25, 4 }
 0x30f   : > { %v596_v29 = vadd.f32 %v595_v28, %v594_v26 }
 0x310   : > { %v586_v15 = vadd.f32 %v585_v27, %v584_v25 }
 0x311   : > { %v597_v31 = vrot.slane %v596_v29, 2 }
 0x312   : > { %v587_v30 = vrot.slane %v586_v15, 2 }
 0x313   : > { %v598_v35 = vadd.f32 %v597_v31, %v596_v29 }
 0x314   : > { %v588_v34 = vadd.f32 %v587_v30, %v586_v15 }
 0x315   : > { %v599_v37 = vrot.slane %v598_v35, 1 }
 0x316   : > { %v589_v36 = vrot.slane %v588_v34, 1 }
 0x317   : > { %v600_v41 = vadd.f32 %v599_v37, %v598_v35 }
 0x318   : > { %v590_v39 = vadd.f32 %v589_v36, %v588_v34 }
 0x319   : > { %vm610_vm15 = vcmp.eq.f32.partialorder %v600_v41, inf  ;;  %vm612_vm1 = vcmp.eq.f32.partialorder %v600_v41, 0.0 }
 0x31a   : > { %vm603_vm14 = vcmp.eq.f32.partialorder %v590_v39, inf  ;;  %vm605_vm0 = vcmp.eq.f32.partialorder %v590_v39, 0.0 }
 0x341   : > { %v445_v1 = vpop.f32.mrf.mxu0 }
 0x342   : > { %v525_v3 = vpop.f32.mrf.mxu1  ;;  %v534_v5 = vmul.f32 2.0, %v445_v1 }
 0x343   : > { %v532_v6 = vrot.slane %v525_v3, %v1209_v0  ;;  %v780_v7 = vpop.f32.mrf.mxu0  ;;  %v606_v3 = vand.u32 2147483648, %v590_v39 }
 0x344   : > { %v785_v8 = vpop.f32.mrf.mxu1 }
 0x345   : > { %v533_v9 = vadd.f32 %v532_v6, %v452_v4  ;;  %v367_v8 = vmul.f32 0.125, %v366_v63 }
 0x347   : > { %v535_v10 = vsub.f32 %v533_v9, %v534_v5 }
 0x349   : > { %v536_v11 = vmax.f32 %v535_v10, 1e-12 }
 0x34b   : > { %879 = vrsqrt.f32 %v536_v11  ;;  %vm539_vm9 = vcmp.eq.f32.partialorder %v536_v11, inf  ;;  %v542_v17 = vand.u32 2147483648, %v536_v11  ;;  %vm541_vm10 = vcmp.eq.f32.partialorder %v536_v11, 0.0 }
 0x34c   : > { %881 = vrsqrt.f32 %v590_v39 }
 0x34d   : > { %883 = vrsqrt.f32 %v600_v41 }
 0x358   : > { %v880_v16 = vpop.eup %879 }
 0x359   : > { %v538_v13 = vmul.f32 %v880_v16, %v536_v11  ;;  %v882_v49 = vpop.eup %881 }
 0x35a   : > { %v884_v53 = vpop.eup %883  ;;  %v602_v57 = vmul.f32 %v882_v49, %v590_v39 }
 0x35b   : > { %v540_v18 = vsel %vm539_vm9, %v536_v11, %v538_v13  ;;  %v609_v60 = vmul.f32 %v884_v53, %v600_v41  ;;  %vm668_vm9 = vcmask 57344  }
 0x35c   : > { %v543_v19 = vsel %vm541_vm10, %v542_v17, %v540_v18  ;;  %v604_v1 = vsel %vm603_vm14, %v590_v39, %v602_v57 }
 0x35d   : > { %v549_v20 = vsel %vm373_vm8, 1e+30, %v543_v19  ;;  %v544_v21 = vsel %vm373_vm8, %v543_v19, -1e+30  ;;  %v611_v6 = vsel %vm610_vm15, %v600_v41, %v609_v60  ;;  %v607_v10 = vsel %vm605_vm0, %v606_v3, %v604_v1  ;;  %v354_v19 = vld [vmem:[#allocation6] sm:$0x1] }
 0x35e   : > { %v550_v22 = vsel %vm545_vm11, %v549_v20, inf  ;;  %v546_v23 = vsel %vm545_vm11, %v544_v21, -inf  ;;  %vm665_vm8 = vcmp.eq.s32.totalorder %v1179_v14, 6 }
 0x35f   : > { %551 = vmin.xlane.f32.xlu0 %v550_v22  ;;  %547 = vmax.xlane.f32.xlu1 %v546_v23 }
 0x3e8   : > { %v552_v45 = vpop.xlane.xlu0 %551  ;;  %v548_v46 = vpop.xlane.xlu1 %547 }
 0x3e9   : > { %v553_v2 = vsub.f32 %v548_v46, %v552_v45  ;;  %vm564_vm13 = vcmp.gt.f32.partialorder %v552_v45, %v548_v46 }
 0x3ea   : > { %v765_v48 = vsel %vm564_vm13, 1.0, %v1031_v51  ;;  %v613_v51 = vand.u32 2147483648, %v600_v41 }
 0x3eb   : > { %v554_v50 = vadd.f32 0.5, %v553_v2  ;;  %v567_v52 = vrot.slane %v765_v48, 4 }
 0x3ec   : > { %v614_v11 = vsel %vm612_vm1, %v613_v51, %v611_v6 }
 0x3ed   : > { %v555_v54 = vmax.f32 %v554_v50, 0.0  ;;  %v568_v55 = vadd.f32 %v765_v48, %v567_v52  ;;  %v615_v18 = vadd.f32 %v614_v11, %v607_v10 }
 0x3ef   : > { %v556_v58 = vrot.slane %v555_v54, 4  ;;  %v569_v59 = vrot.slane %v568_v55, 2  ;;  %v617_v22 = vmul.f32 0.1, %v615_v18  ;;  %v666_v40 = vsel %vm665_vm8, %v615_v18, 0.0 }
 0x3f1   : > { %v557_v61 = vadd.f32 %v556_v58, %v555_v54  ;;  %v570_v62 = vadd.f32 %v569_v59, %v568_v55 }
 0x3f3   : > { %v558_v4 = vrot.slane %v557_v61, 2  ;;  %v571_v5 = vrot.slane %v570_v62, 1 }
 0x3f5   : > { %v559_v7 = vadd.f32 %v558_v4, %v557_v61  ;;  %v572_v9 = vadd.f32 %v571_v5, %v570_v62 }
 0x3f7   : > { %v560_v12 = vrot.slane %v559_v7, 1  ;;  %v573_v16 = vmul.f32 0.125, %v572_v9 }
 0x3f9   : > { %v619_v13 = vmax.f32 %v573_v16, %v367_v8  ;;  %v561_v17 = vadd.f32 %v560_v12, %v559_v7  ;;  %v640_v30 = vsel %vm639_vm4, %v573_v16, 0.0 }
 0x3fb   : > { %634 = vperm.xlu0 %878, %v619_v13   ;;  %v562_v20 = vmul.f32 0.125, %v561_v17 }
 0x3fd   : > { %v616_v21 = vadd.f32 %v562_v20, %v354_v19  ;;  %v651_v35 = vsel %vm650_vm6, %v562_v20, 0.0 }
 0x3ff   : > { %v618_v23 = vadd.f32 %v617_v22, %v616_v21 }
 0x401   : > { %623 = vperm.xlu1 %877, %v618_v23  }
 0x405   : > { %645 = vperm.xlu1 %877, %v367_v8  }
 0x409   : > { %656 = vperm.xlu1 %877, %v354_v19  }
 0x476   : > { %v635_v24 = vpop.permute.xlu0 %634 }
 0x477   : > { %v637_v27 = vsel %vm631_vm2, %v635_v24, 0.0 }
 0x47c   : > { %v624_v25 = vpop.permute.xlu1 %623 }
 0x47d   : > { %v629_v26 = vrot.slane %v624_v25, %v1209_v0 }
 0x47f   : > { %v630_v28 = vsel %vm620_vm3, %v629_v26, 0.0 }
 0x480   : > { %v638_v15 = vadd.f32 %v637_v27, %v630_v28  ;;  %v646_v29 = vpop.permute.xlu1 %645 }
 0x481   : > { %v648_v32 = vsel %vm642_vm5, %v646_v29, 0.0 }
 0x482   : > { %v641_v31 = vadd.f32 %v640_v30, %v638_v15 }
 0x484   : > { %v649_v33 = vadd.f32 %v648_v32, %v641_v31  ;;  %v657_v34 = vpop.permute.xlu1 %656 }
 0x485   : > { %v662_v36 = vrot.slane %v657_v34, %v1209_v0 }
 0x486   : > { %v652_v37 = vadd.f32 %v651_v35, %v649_v33 }
 0x487   : > { %v663_v38 = vsel %vm653_vm7, %v662_v36, 0.0 }
 0x488   : > { %v664_v39 = vadd.f32 %v663_v38, %v652_v37 }
 0x48a   : > { %v667_v41 = vadd.f32 %v666_v40, %v664_v39 }
 0x48c   : > { %669 = vst.msk [vmem:[#allocation12] sm:$0x1] %vm668_vm9, %v667_v41 }
 0x48d PF: > { %p1231_p10 = scmp.eq.s32.totalorder %s747_s24, 1  ;;  %s1035_s7 = smov [#allocation12]  }
 0x48e   : > { %s677_s8 = sshll.u32 %s1035_s7, 4  ;;  %s678_s8 = int_to_ptr.vmem [resolvable:$true] %s677_s8 }
 0x48f   : > { %s939_s9 = scalar_lea.vmem %s678_s8, 16  ;;  %s945_s10 = scalar_lea.vmem %s678_s8, 32 }
 0x490   : > { %p940_p11 = scmp.ne.s32.totalorder %s678_s8, %s939_s9  ;;  %p946_p13 = scmp.lt.s32.totalorder %s678_s8, %s678_s8 }
 0x491   : > { %p947_p0 = scmp.lt.s32.totalorder %s945_s10, %s939_s9 }
 0x492   : > { %p941_p7 = pnand %p940_p11, %p1231_p10 }
 0x493   : > { %p948_p2 = por %p947_p0, %p946_p13 }
 0x494   : > { %p942_p12 = pneg %p941_p7 }
 0x496   : > { %p949_p3 = pnand %p948_p2, %p942_p12 }
 0x498   : > { %952 = shalt.err (!%p949_p3)
}
 0x499   : > { %793 = dma.vmem_to_hbm [thread:$0]  (%p1231_p10), %s678_s8, 16, %s1269_s5, [#allocation9]  }
 0x49a   : > { %996 = dma.done.wait (%p1231_p10), [#allocation9], 16  }
 0x49b   : > { %998 = vsyncadd (%p1231_p10), [#allocation9], 4294967280 }
 0x49c PF: > { %s20_s23 = sadd.s32 1, %s1021_s23   ;;  %s1276_s18 = smov %s1005_s19 }
 0x49d   : > { %p17_p6 = scmp.ge.s32.totalorder %s20_s23, 4   ;;  %s1277_s19 = smov %s1009_s20 }
 0x49e   : > { %s1278_s20 = smov %s1142_s17  ;;  %s1279_s21 = smov %s1017_s22 }
 0x49f   : > { %s1280_s22 = smov %s1282_s6  ;;  %19 = sbr.rel (!%p17_p6) target bundleno = 6 (0x6), region = 103 }
 0x4a4   :  { %690 = vsyncpa [#allocation8], 1 }
 0x4a5   :  { %692 = vsyncpa [#allocation8 + $0x1], 1 }
 0x4a6   :  { %693 = vsyncpa [#allocation11], 1 }
 0x4a7   :  { %694 = vsyncpa [#allocation9], 1 }
 0x4a8   :  { %696 = vsyncpa [#allocation9 + $0x1], 1 }

</bundles_post_ra>
